<compile_context>
chip_gen: v7x
topology: tpu7x:2x2x1
jax: 0.10.0
libtpu: 0.0.40
codegen_flags: <defaults>
</compile_context>

<pallas_src>
import math
from collections import OrderedDict

import jax
import jax.numpy as jnp
from jax.experimental import pallas as pl
from jax.experimental.pallas import tpu as pltpu

HIDDEN = 8            # hidden channels of the synthetic DB head
HEAD_PAD = 8          # head rows padded 2 -> 8 (clean MXU / sublane tiles)
DB_K = 50.0           # differentiable-binarization steepness
EPS = 1e-6
ALPHA = 5.0           # BCE weight (DBLoss default)
BETA = 10.0           # L1 weight  (DBLoss default)

NCORES = 2            # leading 'parallel' grid axis: uses both v7x TCs,
                      # runs as a cheap sequential loop on 1-TC v5e/v6e.
VMEM_LIMIT_BYTES = 64 * 1024 * 1024


def _round_up(x, m):
    return ((x + m - 1) // m) * m


# ----------------------------------------------------------------------------
# Kernel bodies
# ----------------------------------------------------------------------------
def _db_head(patches_ref, w1t_ref, b1_ref, wht_ref, bh_ref):
    """3x3 conv (im2col'd, bf16 MXU feed) + ReLU + 1x1 heads + DB binarize."""
    x = patches_ref[...]                                        # (Kpad, TM) bf16
    h = jnp.dot(w1t_ref[...], x, preferred_element_type=jnp.float32)
    h = jnp.maximum(h + b1_ref[...], 0.0)                       # (HIDDEN, TM) f32
    z = jnp.dot(wht_ref[...], h,
                preferred_element_type=jnp.float32) + bh_ref[...]   # (8, TM) f32
    pt = jax.nn.sigmoid(z[0:2, :])                              # p,t in one EUP slab
    b = jax.nn.sigmoid(DB_K * (pt[0:1, :] - pt[1:2, :]))        # approx binary
    return z, pt, b


def _db_train_kernel(patches_ref, targets_ref, w1t_ref, b1_ref, wht_ref,
                     bh_ref, maps_ref, partials_ref, acc_ref):
    i = pl.program_id(1)

    @pl.when(i == 0)
    def _init():
        acc_ref[...] = jnp.zeros_like(acc_ref)

    z, pt, b = _db_head(patches_ref, w1t_ref, b1_ref, wht_ref, bh_ref)
    # lane-dense bf16 map rows, stored directly (no concatenate)
    maps_ref[0:2, :] = pt.astype(maps_ref.dtype)        # prob / thresh
    maps_ref[2:3, :] = b.astype(maps_ref.dtype)         # approx binary

    # --------- loss partial sums: lane-wide VMEM accumulation ---------------
    tgt = targets_ref[...].astype(jnp.float32)          # (4, TM)
    g, m = tgt[0:1, :], tgt[1:2, :]
    tg, tmsk = tgt[2:3, :], tgt[3:4, :]
    zp = z[0:1, :]
    t = pt[1:2, :]
    # TODO(synk): real DBLoss applies OHEM hard-negative mining (global top-k)
    # to the BCE term; plain masked BCE is used here instead.
    sp = jnp.maximum(zp, 0.0) + jnp.log(1.0 + jnp.exp(-jnp.abs(zp)))  # softplus
    acc_ref[0:1, :] += (sp - g * zp) * m          # bce numerator
    acc_ref[1:2, :] += m                          # bce denominator
    acc_ref[2:3, :] += jnp.abs(t - tg) * tmsk     # l1 numerator
    acc_ref[3:4, :] += tmsk                       # l1 denominator
    acc_ref[4:5, :] += b * g * m                  # dice intersection
    acc_ref[5:6, :] += (b * b + g * g) * m        # dice union
    # TODO(synk): packing the six terms into one dense (8, TM) add (full
    # sublane occupancy) would cut the remaining 1/8-occupancy VPU adds.

    @pl.when(i == pl.num_programs(1) - 1)
    def _finalize():
        # single dense cross-lane reduce per core; tiny per-core partial write
        partials_ref[0] = jnp.sum(acc_ref[...], axis=-1, keepdims=True)


def _db_infer_kernel(patches_ref, w1t_ref, b1_ref, wht_ref, bh_ref, maps_ref):
    _, pt, b = _db_head(patches_ref, w1t_ref, b1_ref, wht_ref, bh_ref)
    maps_ref[0:2, :] = pt.astype(maps_ref.dtype)
    maps_ref[2:3, :] = b.astype(maps_ref.dtype)


# ----------------------------------------------------------------------------
# pallas_call wrappers
# ----------------------------------------------------------------------------
def _cost_estimate(Kpad, M_pad, training):
    flops = (2 * Kpad * HIDDEN + 2 * HIDDEN * HEAD_PAD
             + (64 if training else 24)) * M_pad
    bytes_accessed = (2 * Kpad + 6 + (8 if training else 0)) * M_pad
    return pl.CostEstimate(flops=flops, transcendentals=5 * M_pad,
                           bytes_accessed=bytes_accessed)


def db_train_forward(patches_t, targets, w1t, b1, wht, bh, *, tile_m):
    """patches_t: (Kpad, M_pad) bf16, targets: (4, M_pad) bf16."""
    Kpad, M_pad = patches_t.shape
    TM = tile_m
    assert TM % 128 == 0 and M_pad % (NCORES * TM) == 0
    npc = (M_pad // TM) // NCORES                   # tiles per core

    grid_spec = pltpu.PrefetchScalarGridSpec(
        num_scalar_prefetch=0,
        grid=(NCORES, npc),
        in_specs=[
            pl.BlockSpec((Kpad, TM), lambda c, i: (0, c * npc + i)),   # patches bf16
            pl.BlockSpec((4, TM), lambda c, i: (0, c * npc + i)),      # gt/mask/tmap/tmask
            pl.BlockSpec((HIDDEN, Kpad), lambda c, i: (0, 0)),         # w1^T bf16
            pl.BlockSpec((HIDDEN, 1), lambda c, i: (0, 0)),            # b1
            pl.BlockSpec((HEAD_PAD, HIDDEN), lambda c, i: (0, 0)),     # head w^T
            pl.BlockSpec((HEAD_PAD, 1), lambda c, i: (0, 0)),          # head bias
        ],
        out_specs=[
            pl.BlockSpec((3, TM), lambda c, i: (0, c * npc + i)),      # p/t/b maps (bf16)
            pl.BlockSpec((1, 8, 1), lambda c, i: (c, 0, 0)),           # per-core partials
        ],
        scratch_shapes=[pltpu.VMEM((8, TM), jnp.float32)],             # loss accumulator
    )
    out_shapes = (
        jax.ShapeDtypeStruct((3, M_pad), jnp.bfloat16),
        jax.ShapeDtypeStruct((NCORES, 8, 1), jnp.float32),
    )
    return pl.pallas_call(
        _db_train_kernel,
        out_shape=out_shapes,
        grid_spec=grid_spec,
        compiler_params=pltpu.CompilerParams(
            dimension_semantics=("parallel", "arbitrary"),
            vmem_limit_bytes=VMEM_LIMIT_BYTES),
        cost_estimate=_cost_estimate(Kpad, M_pad, True),
    )(patches_t, targets, w1t, b1, wht, bh)


def db_infer_forward(patches_t, w1t, b1, wht, bh, *, tile_m):
    Kpad, M_pad = patches_t.shape
    TM = tile_m
    assert TM % 128 == 0 and M_pad % TM == 0
    n_tiles = M_pad // TM

    grid_spec = pltpu.PrefetchScalarGridSpec(
        num_scalar_prefetch=0,
        grid=(n_tiles,),
        in_specs=[
            pl.BlockSpec((Kpad, TM), lambda i: (0, i)),
            pl.BlockSpec((HIDDEN, Kpad), lambda i: (0, 0)),
            pl.BlockSpec((HIDDEN, 1), lambda i: (0, 0)),
            pl.BlockSpec((HEAD_PAD, HIDDEN), lambda i: (0, 0)),
            pl.BlockSpec((HEAD_PAD, 1), lambda i: (0, 0)),
        ],
        out_specs=pl.BlockSpec((3, TM), lambda i: (0, i)),
    )
    return pl.pallas_call(
        _db_infer_kernel,
        out_shape=jax.ShapeDtypeStruct((3, M_pad), jnp.bfloat16),
        grid_spec=grid_spec,
        compiler_params=pltpu.CompilerParams(
            dimension_semantics=("parallel",),
            vmem_limit_bytes=VMEM_LIMIT_BYTES),
        cost_estimate=_cost_estimate(Kpad, M_pad, False),
    )(patches_t, w1t, b1, wht, bh)


# ----------------------------------------------------------------------------
# Glue (plain JAX): im2col in kernel layout, parameters, LossModel wrapper
# ----------------------------------------------------------------------------
def im2col_patches_kM(img_nchw, Kpad, M_pad):
    """3x3 'same' patches built directly in (Kpad, M_pad) bf16 layout:
    patch index (dy, dx, c) on sublanes, pixels (n, h, w) on lanes.
    No (M, K) intermediate or HBM transpose."""
    N, C, H, W = img_nchw.shape
    M = N * H * W
    xp = jnp.pad(img_nchw, ((0, 0), (0, 0), (1, 1), (1, 1)))
    rows = []
    for dy in range(3):
        for dx in range(3):
            for c in range(C):
                rows.append(xp[:, c, dy:dy + H, dx:dx + W].reshape(M))
    pk = jnp.stack(rows, axis=0).astype(jnp.bfloat16)            # (K, M)
    return jnp.pad(pk, ((0, Kpad - pk.shape[0]), (0, M_pad - M)))


class LossModel:
    """JAX equivalent of the PyTorch LossModel (DBModel + DBLoss)."""

    def __init__(self, key, in_channels=3, tile_m=32768):
        # tile_m: pixels per grid step (lane axis).  32768 keeps the
        # double-buffered working set (~10-20 MiB) well under v7x's 64 MiB
        # VMEM while amortizing the ~0.35 us per-step grid overhead;
        # sweep 16k..64k in production.
        self.tile_m = _round_up(max(tile_m, 128), 128)
        self.K = 9 * in_channels
        self.Kpad = _round_up(self.K, 16)      # bf16 sublane packing (16/vreg)
        k1, k2 = jax.random.split(key, 2)
        w1 = (jax.random.normal(k1, (self.K, HIDDEN), jnp.float32)
              * (1.0 / math.sqrt(self.K)))
        # (HIDDEN, Kpad) bf16: fed straight to the MXU (native bf16 operand).
        self.w1t = jnp.pad(
            w1.T, ((0, 0), (0, self.Kpad - self.K))).astype(jnp.bfloat16)
        self.b1 = jnp.zeros((HIDDEN, 1), jnp.float32)
        wh = (jax.random.normal(k2, (HIDDEN, 2), jnp.float32)
              * (1.0 / math.sqrt(HIDDEN)))
        self.wht = jnp.pad(wh.T, ((0, HEAD_PAD - 2), (0, 0)))
        self.bh = jnp.zeros((HEAD_PAD, 1), jnp.float32)

    def __call__(self, batch, training=True):
        img = batch['img']                      # (N, C, H, W), NCHW
        # TODO(synk): batch['shape'] is only used by DBNet post-processing at
        # inference (polygon rescaling); it has no effect on this forward.
        _ = batch['shape']
        N, C, H, W = img.shape
        M = N * H * W
        TM = min(self.tile_m, _round_up(M, 128))
        M_pad = _round_up(M, NCORES * TM)

        # TODO(synk): an in-kernel halo conv (stream the bf16 image + 9
        # shifted matmuls with boundary masks) would cut the remaining
        # ~2*Kpad B/pixel im2col HBM stream ~9x.
        patches_t = im2col_patches_kM(img, self.Kpad, M_pad)

        if not training:
            maps = db_infer_forward(patches_t, self.w1t, self.b1, self.wht,
                                    self.bh, tile_m=TM)
            return self._pred(maps, N, H, W, M)

        tgt = jnp.stack([batch['gt'].reshape(M),
                         batch['mask'].reshape(M),
                         batch['thresh_map'].reshape(M),
                         batch['thresh_mask'].reshape(M)], axis=0)
        targets = jnp.pad(tgt.astype(jnp.bfloat16), ((0, 0), (0, M_pad - M)))

        maps, partials = db_train_forward(patches_t, targets, self.w1t,
                                          self.b1, self.wht, self.bh,
                                          tile_m=TM)
        # Combine per-core partial sums (tiny scalar math, done in JAX).
        s = jnp.sum(partials[:, :, 0], axis=0)
        bce = s[0] / (s[1] + EPS)
        l1 = s[2] / (s[3] + EPS)
        dice = 1.0 - 2.0 * s[4] / (s[5] + EPS)
        loss = ALPHA * bce + BETA * l1 + dice
        metric = OrderedDict(bce_loss=bce, l1_loss=l1, dice_loss=dice)
        return self._pred(maps, N, H, W, M), loss, metric

    @staticmethod
    def _pred(maps, N, H, W, M):
        as_nchw = lambda r: maps[r, :M].astype(jnp.float32).reshape(N, 1, H, W)
        return OrderedDict(
            binary=as_nchw(0),          # probability map (NCHW)
            thresh=as_nchw(1),          # threshold map
            thresh_binary=as_nchw(2),   # approx binary map
        )


# ----------------------------------------------------------------------------
# Main
# ----------------------------------------------------------------------------
if __name__ == "__main__":
    key = jax.random.PRNGKey(0)
    k_img, k_gt, k_tm, k_params = jax.random.split(key, 4)

    N, C, H, W = 2, 3, 16, 16
    img = jax.random.normal(k_img, (N, C, H, W), jnp.float32)
    gt = (jax.random.uniform(k_gt, (N, 1, H, W)) > 0.7).astype(jnp.float32)
    mask = jnp.ones((N, 1, H, W), jnp.float32)
    thresh_map = jax.random.uniform(k_tm, (N, 1, H, W), jnp.float32)
    thresh_mask = jnp.ones((N, 1, H, W), jnp.float32)
    shape = jnp.array([[H, W]] * N, jnp.int32)

    batch = OrderedDict(img=img, shape=shape, gt=gt, mask=mask,
                        thresh_map=thresh_map, thresh_mask=thresh_mask)

    # tile_m=128 -> M=512 runs as a (2 cores x 2 tiles) grid, exercising the
    # per-core cross-tile accumulator + partial-combine path.
    model = LossModel(k_params, in_channels=C, tile_m=128)
    pred, loss, metric = model(batch, training=True)
    jax.block_until_ready(loss)
    jax.block_until_ready(pred['binary'])

    pred_inf = model(batch, training=False)        # targets-free kernel path
    jax.block_until_ready(pred_inf['binary'])

    # ---- pure-JAX reference (same bf16 rounding of the HBM streams) --------
    M = N * H * W
    Xf = im2col_patches_kM(img, model.Kpad, M).astype(jnp.float32)
    h_ref = jnp.maximum(model.w1t.astype(jnp.float32) @ Xf + model.b1, 0.0)
    z_ref = model.wht @ h_ref + model.bh
    zp_r, zt_r = z_ref[0:1], z_ref[1:2]
    p_r = jax.nn.sigmoid(zp_r)
    t_r = jax.nn.sigmoid(zt_r)
    b_r = jax.nn.sigmoid(DB_K * (p_r - t_r))
    bf = lambda a: a.reshape(1, M).astype(jnp.bfloat16).astype(jnp.float32)
    g_r, m_r, tg_r, tmsk_r = bf(gt), bf(mask), bf(thresh_map), bf(thresh_mask)
    sp_r = jnp.maximum(zp_r, 0.0) + jnp.log(1.0 + jnp.exp(-jnp.abs(zp_r)))
    bce_r = jnp.sum((sp_r - g_r * zp_r) * m_r) / (jnp.sum(m_r) + EPS)
    l1_r = jnp.sum(jnp.abs(t_r - tg_r) * tmsk_r) / (jnp.sum(tmsk_r) + EPS)
    dice_r = 1.0 - 2.0 * jnp.sum(b_r * g_r * m_r) / (
        jnp.sum(b_r * b_r * m_r) + jnp.sum(g_r * g_r * m_r) + EPS)
    loss_r = ALPHA * bce_r + BETA * l1_r + dice_r

    assert jnp.allclose(loss, loss_r, rtol=2e-2, atol=2e-3)
    assert jnp.allclose(metric['bce_loss'], bce_r, rtol=2e-2, atol=2e-3)
    assert jnp.allclose(pred['binary'], p_r.reshape(N, 1, H, W), atol=2e-2)
    assert jnp.allclose(pred['thresh_binary'], b_r.reshape(N, 1, H, W), atol=2e-2)
    assert jnp.allclose(pred_inf['binary'], p_r.reshape(N, 1, H, W), atol=2e-2)

    print("KERNEL_OK")
</pallas_src>

<mosaic_0001>
module attributes {stable_mosaic.version = 11 : i64} {
  func.func @_db_train_kernel(%arg0: i32, %arg1: i32, %arg2: memref<32x128xbf16, #tpu.memory_space<vmem>>, %arg3: memref<4x128xbf16, #tpu.memory_space<vmem>>, %arg4: memref<8x32xbf16, #tpu.memory_space<vmem>>, %arg5: memref<8x1xf32, #tpu.memory_space<vmem>>, %arg6: memref<8x8xf32, #tpu.memory_space<vmem>>, %arg7: memref<8x1xf32, #tpu.memory_space<vmem>>, %arg8: memref<3x128xbf16, #tpu.memory_space<vmem>>, %arg9: memref<1x8x1xf32, #tpu.memory_space<vmem>>, %arg10: memref<8x128xf32, #tpu.memory_space<vmem>>) attributes {dimension_semantics = [#tpu.dimension_semantics<parallel>, #tpu.dimension_semantics<arbitrary>], iteration_bounds = array<i64: 2, 2>, scalar_prefetch = 0 : i64, scratch_operands = 1 : i64, tpu.core_type = #tpu.core_type<tc>, window_params = [{transform_indices = @transform_0, window_bounds = array<i64: 32, 128>}, {transform_indices = @transform_1, window_bounds = array<i64: 4, 128>}, {pipeline_mode = #tpu.pipeline_mode<synchronous>, transform_indices = @transform_2, window_bounds = array<i64: 8, 32>}, {pipeline_mode = #tpu.pipeline_mode<synchronous>, transform_indices = @transform_3, window_bounds = array<i64: 8, 1>}, {pipeline_mode = #tpu.pipeline_mode<synchronous>, transform_indices = @transform_4, window_bounds = array<i64: 8, 8>}, {pipeline_mode = #tpu.pipeline_mode<synchronous>, transform_indices = @transform_5, window_bounds = array<i64: 8, 1>}, {transform_indices = @transform_6, window_bounds = array<i64: 3, 128>}, {transform_indices = @transform_7, window_bounds = array<i64: 1, 8, 1>}]} {
    %c0_i32 = arith.constant 0 : i32
    %0 = arith.cmpi eq, %arg1, %c0_i32 : i32
    %1 = arith.extui %0 : i1 to i32
    %c0_i32_0 = arith.constant 0 : i32
    %2 = arith.cmpi ne, %1, %c0_i32_0 : i32
    scf.if %2 {
      %cst_44 = arith.constant 0.000000e+00 : f32
      %87 = vector.broadcast %cst_44 : f32 to vector<8x128xf32>
      %c0_45 = arith.constant 0 : index
      %c0_46 = arith.constant 0 : index
      %88 = vector.load %arg10[%c0_45, %c0_46] : memref<8x128xf32, #tpu.memory_space<vmem>>, vector<8x128xf32>
      tpu.vector_store %arg10[%c0_45, %c0_46], %87 {strides = array<i32>} : memref<8x128xf32, #tpu.memory_space<vmem>>, vector<8x128xf32>,
    } else {
    }
    %c0 = arith.constant 0 : index
    %c0_1 = arith.constant 0 : index
    %3 = vector.load %arg2[%c0, %c0_1] : memref<32x128xbf16, #tpu.memory_space<vmem>>, vector<32x128xbf16>
    %c0_2 = arith.constant 0 : index
    %c0_3 = arith.constant 0 : index
    %4 = vector.load %arg4[%c0_2, %c0_3] : memref<8x32xbf16, #tpu.memory_space<vmem>>, vector<8x32xbf16>
    %cst = arith.constant dense<0.000000e+00> : vector<8x128xf32>
    %5 = tpu.matmul %4, %3, %cst {dimension_numbers = #tpu.dot_dimension_numbers<[1], [0], [0], [1], [0, 0, 1, 1], [], []>} : vector<8x32xbf16>, vector<32x128xbf16>, vector<8x128xf32> -> vector<8x128xf32>
    %c0_4 = arith.constant 0 : index
    %c0_5 = arith.constant 0 : index
    %6 = vector.load %arg5[%c0_4, %c0_5] : memref<8x1xf32, #tpu.memory_space<vmem>>, vector<8x1xf32>
    %7 = vector.broadcast %6 : vector<8x1xf32> to vector<8x128xf32>
    %8 = arith.addf %5, %7 : vector<8x128xf32>
    %cst_6 = arith.constant 0.000000e+00 : f32
    %9 = vector.broadcast %cst_6 : f32 to vector<8x128xf32>
    %10 = arith.maximumf %8, %9 : vector<8x128xf32>
    %c0_7 = arith.constant 0 : index
    %c0_8 = arith.constant 0 : index
    %11 = vector.load %arg6[%c0_7, %c0_8] : memref<8x8xf32, #tpu.memory_space<vmem>>, vector<8x8xf32>
    %cst_9 = arith.constant dense<0.000000e+00> : vector<8x128xf32>
    %12 = tpu.matmul %11, %10, %cst_9 {dimension_numbers = #tpu.dot_dimension_numbers<[1], [0], [0], [1], [0, 0, 1, 1], [], []>} : vector<8x8xf32>, vector<8x128xf32>, vector<8x128xf32> -> vector<8x128xf32>
    %c0_10 = arith.constant 0 : index
    %c0_11 = arith.constant 0 : index
    %13 = vector.load %arg7[%c0_10, %c0_11] : memref<8x1xf32, #tpu.memory_space<vmem>>, vector<8x1xf32>
    %14 = vector.broadcast %13 : vector<8x1xf32> to vector<8x128xf32>
    %15 = arith.addf %12, %14 : vector<8x128xf32>
    %16 = vector.extract_strided_slice %15 {offsets = [0, 0], sizes = [2, 128], strides = [1, 1]} : vector<8x128xf32> to vector<2x128xf32>
    %17 = arith.negf %16 : vector<2x128xf32>
    %18 = math.exp %17 : vector<2x128xf32>
    %cst_12 = arith.constant 1.000000e+00 : f32
    %19 = vector.broadcast %cst_12 : f32 to vector<2x128xf32>
    %20 = arith.addf %19, %18 : vector<2x128xf32>
    %21 = arith.divf %19, %20 : vector<2x128xf32>
    %22 = vector.extract_strided_slice %21 {offsets = [0, 0], sizes = [1, 128], strides = [1, 1]} : vector<2x128xf32> to vector<1x128xf32>
    %23 = vector.extract_strided_slice %21 {offsets = [1, 0], sizes = [1, 128], strides = [1, 1]} : vector<2x128xf32> to vector<1x128xf32>
    %24 = arith.subf %22, %23 : vector<1x128xf32>
    %cst_13 = arith.constant 5.000000e+01 : f32
    %25 = vector.broadcast %cst_13 : f32 to vector<1x128xf32>
    %26 = arith.mulf %25, %24 : vector<1x128xf32>
    %27 = arith.negf %26 : vector<1x128xf32>
    %28 = math.exp %27 : vector<1x128xf32>
    %cst_14 = arith.constant 1.000000e+00 : f32
    %29 = vector.broadcast %cst_14 : f32 to vector<1x128xf32>
    %30 = arith.addf %29, %28 : vector<1x128xf32>
    %31 = arith.divf %29, %30 : vector<1x128xf32>
    %32 = arith.truncf %21 : vector<2x128xf32> to vector<2x128xbf16>
    %c0_15 = arith.constant 0 : index
    %c0_16 = arith.constant 0 : index
    %33 = vector.load %arg8[%c0_15, %c0_16] : memref<3x128xbf16, #tpu.memory_space<vmem>>, vector<2x128xbf16>
    tpu.vector_store %arg8[%c0_15, %c0_16], %32 {strides = array<i32>} : memref<3x128xbf16, #tpu.memory_space<vmem>>, vector<2x128xbf16>,
    %34 = arith.truncf %31 : vector<1x128xf32> to vector<1x128xbf16>
    %c2 = arith.constant 2 : index
    %c0_17 = arith.constant 0 : index
    %35 = vector.load %arg8[%c2, %c0_17] : memref<3x128xbf16, #tpu.memory_space<vmem>>, vector<1x128xbf16>
    tpu.vector_store %arg8[%c2, %c0_17], %34 {strides = array<i32>} : memref<3x128xbf16, #tpu.memory_space<vmem>>, vector<1x128xbf16>,
    %c0_18 = arith.constant 0 : index
    %c0_19 = arith.constant 0 : index
    %36 = vector.load %arg3[%c0_18, %c0_19] : memref<4x128xbf16, #tpu.memory_space<vmem>>, vector<4x128xbf16>
    %37 = arith.extf %36 : vector<4x128xbf16> to vector<4x128xf32>
    %38 = vector.extract_strided_slice %37 {offsets = [0, 0], sizes = [1, 128], strides = [1, 1]} : vector<4x128xf32> to vector<1x128xf32>
    %39 = vector.extract_strided_slice %37 {offsets = [1, 0], sizes = [1, 128], strides = [1, 1]} : vector<4x128xf32> to vector<1x128xf32>
    %40 = vector.extract_strided_slice %37 {offsets = [2, 0], sizes = [1, 128], strides = [1, 1]} : vector<4x128xf32> to vector<1x128xf32>
    %41 = vector.extract_strided_slice %37 {offsets = [3, 0], sizes = [1, 128], strides = [1, 1]} : vector<4x128xf32> to vector<1x128xf32>
    %42 = vector.extract_strided_slice %15 {offsets = [0, 0], sizes = [1, 128], strides = [1, 1]} : vector<8x128xf32> to vector<1x128xf32>
    %43 = vector.extract_strided_slice %21 {offsets = [1, 0], sizes = [1, 128], strides = [1, 1]} : vector<2x128xf32> to vector<1x128xf32>
    %cst_20 = arith.constant 0.000000e+00 : f32
    %44 = vector.broadcast %cst_20 : f32 to vector<1x128xf32>
    %45 = arith.maximumf %42, %44 : vector<1x128xf32>
    %46 = math.absf %42 : vector<1x128xf32>
    %cst_21 = arith.constant 0.000000e+00 : f32
    %47 = vector.broadcast %cst_21 : f32 to vector<1x128xf32>
    %48 = arith.subf %47, %46 : vector<1x128xf32>
    %49 = math.exp %48 : vector<1x128xf32>
    %cst_22 = arith.constant 1.000000e+00 : f32
    %50 = vector.broadcast %cst_22 : f32 to vector<1x128xf32>
    %51 = arith.addf %50, %49 : vector<1x128xf32>
    %52 = math.log %51 : vector<1x128xf32>
    %53 = arith.addf %45, %52 : vector<1x128xf32>
    %c0_23 = arith.constant 0 : index
    %c0_24 = arith.constant 0 : index
    %54 = vector.load %arg10[%c0_23, %c0_24] : memref<8x128xf32, #tpu.memory_space<vmem>>, vector<1x128xf32>
    %55 = arith.mulf %38, %42 : vector<1x128xf32>
    %56 = arith.subf %53, %55 : vector<1x128xf32>
    %57 = arith.mulf %56, %39 : vector<1x128xf32>
    %58 = arith.addf %54, %57 : vector<1x128xf32>
    %c0_25 = arith.constant 0 : index
    %c0_26 = arith.constant 0 : index
    %59 = vector.load %arg10[%c0_25, %c0_26] : memref<8x128xf32, #tpu.memory_space<vmem>>, vector<1x128xf32>
    tpu.vector_store %arg10[%c0_25, %c0_26], %58 {strides = array<i32>} : memref<8x128xf32, #tpu.memory_space<vmem>>, vector<1x128xf32>,
    %c1 = arith.constant 1 : index
    %c0_27 = arith.constant 0 : index
    %60 = vector.load %arg10[%c1, %c0_27] : memref<8x128xf32, #tpu.memory_space<vmem>>, vector<1x128xf32>
    %61 = arith.addf %60, %39 : vector<1x128xf32>
    %c1_28 = arith.constant 1 : index
    %c0_29 = arith.constant 0 : index
    %62 = vector.load %arg10[%c1_28, %c0_29] : memref<8x128xf32, #tpu.memory_space<vmem>>, vector<1x128xf32>
    tpu.vector_store %arg10[%c1_28, %c0_29], %61 {strides = array<i32>} : memref<8x128xf32, #tpu.memory_space<vmem>>, vector<1x128xf32>,
    %c2_30 = arith.constant 2 : index
    %c0_31 = arith.constant 0 : index
    %63 = vector.load %arg10[%c2_30, %c0_31] : memref<8x128xf32, #tpu.memory_space<vmem>>, vector<1x128xf32>
    %64 = arith.subf %43, %40 : vector<1x128xf32>
    %65 = math.absf %64 : vector<1x128xf32>
    %66 = arith.mulf %65, %41 : vector<1x128xf32>
    %67 = arith.addf %63, %66 : vector<1x128xf32>
    %c2_32 = arith.constant 2 : index
    %c0_33 = arith.constant 0 : index
    %68 = vector.load %arg10[%c2_32, %c0_33] : memref<8x128xf32, #tpu.memory_space<vmem>>, vector<1x128xf32>
    tpu.vector_store %arg10[%c2_32, %c0_33], %67 {strides = array<i32>} : memref<8x128xf32, #tpu.memory_space<vmem>>, vector<1x128xf32>,
    %c3 = arith.constant 3 : index
    %c0_34 = arith.constant 0 : index
    %69 = vector.load %arg10[%c3, %c0_34] : memref<8x128xf32, #tpu.memory_space<vmem>>, vector<1x128xf32>
    %70 = arith.addf %69, %41 : vector<1x128xf32>
    %c3_35 = arith.constant 3 : index
    %c0_36 = arith.constant 0 : index
    %71 = vector.load %arg10[%c3_35, %c0_36] : memref<8x128xf32, #tpu.memory_space<vmem>>, vector<1x128xf32>
    tpu.vector_store %arg10[%c3_35, %c0_36], %70 {strides = array<i32>} : memref<8x128xf32, #tpu.memory_space<vmem>>, vector<1x128xf32>,
    %c4 = arith.constant 4 : index
    %c0_37 = arith.constant 0 : index
    %72 = vector.load %arg10[%c4, %c0_37] : memref<8x128xf32, #tpu.memory_space<vmem>>, vector<1x128xf32>
    %73 = arith.mulf %31, %38 : vector<1x128xf32>
    %74 = arith.mulf %73, %39 : vector<1x128xf32>
    %75 = arith.addf %72, %74 : vector<1x128xf32>
    %c4_38 = arith.constant 4 : index
    %c0_39 = arith.constant 0 : index
    %76 = vector.load %arg10[%c4_38, %c0_39] : memref<8x128xf32, #tpu.memory_space<vmem>>, vector<1x128xf32>
    tpu.vector_store %arg10[%c4_38, %c0_39], %75 {strides = array<i32>} : memref<8x128xf32, #tpu.memory_space<vmem>>, vector<1x128xf32>,
    %c5 = arith.constant 5 : index
    %c0_40 = arith.constant 0 : index
    %77 = vector.load %arg10[%c5, %c0_40] : memref<8x128xf32, #tpu.memory_space<vmem>>, vector<1x128xf32>
    %78 = arith.mulf %31, %31 : vector<1x128xf32>
    %79 = arith.mulf %38, %38 : vector<1x128xf32>
    %80 = arith.addf %78, %79 : vector<1x128xf32>
    %81 = arith.mulf %80, %39 : vector<1x128xf32>
    %82 = arith.addf %77, %81 : vector<1x128xf32>
    %c5_41 = arith.constant 5 : index
    %c0_42 = arith.constant 0 : index
    %83 = vector.load %arg10[%c5_41, %c0_42] : memref<8x128xf32, #tpu.memory_space<vmem>>, vector<1x128xf32>
    tpu.vector_store %arg10[%c5_41, %c0_42], %82 {strides = array<i32>} : memref<8x128xf32, #tpu.memory_space<vmem>>, vector<1x128xf32>,
    %c1_i32 = arith.constant 1 : i32
    %84 = arith.cmpi eq, %arg1, %c1_i32 : i32
    %85 = arith.extui %84 : i1 to i32
    %c0_i32_43 = arith.constant 0 : i32
    %86 = arith.cmpi ne, %85, %c0_i32_43 : i32
    scf.if %86 {
      %c0_44 = arith.constant 0 : index
      %c0_45 = arith.constant 0 : index
      %87 = vector.load %arg10[%c0_44, %c0_45] : memref<8x128xf32, #tpu.memory_space<vmem>>, vector<8x128xf32>
      %cst_46 = arith.constant dense<0.000000e+00> : vector<8xf32>
      %88 = vector.multi_reduction <add>, %87, %cst_46 [1] : vector<8x128xf32> to vector<8xf32>
      %89 = vector.shape_cast %88 : vector<8xf32> to vector<8x1xf32>
      %c0_47 = arith.constant 0 : index
      %c0_48 = arith.constant 0 : index
      %c0_49 = arith.constant 0 : index
      %90 = vector.load %arg9[%c0_47, %c0_48, %c0_49] : memref<1x8x1xf32, #tpu.memory_space<vmem>>, vector<1x8x1xf32>
      %91 = vector.shape_cast %90 : vector<1x8x1xf32> to vector<8x1xf32>
      %92 = vector.shape_cast %89 : vector<8x1xf32> to vector<1x8x1xf32>
      tpu.vector_store %arg9[%c0_47, %c0_48, %c0_49], %92 {strides = array<i32>} : memref<1x8x1xf32, #tpu.memory_space<vmem>>, vector<1x8x1xf32>,
    } else {
    }
    return
  }
  func.func @transform_0(%arg0: i32, %arg1: i32) -> (i32, i32) {
    %c2_i32 = arith.constant 2 : i32
    %0 = arith.muli %arg0, %c2_i32 : i32
    %1 = arith.addi %0, %arg1 : i32
    %c0_i32 = arith.constant 0 : i32
    %c0_i32_0 = arith.constant 0 : i32
    return %c0_i32, %1 : i32, i32
  }
  func.func @transform_1(%arg0: i32, %arg1: i32) -> (i32, i32) {
    %c2_i32 = arith.constant 2 : i32
    %0 = arith.muli %arg0, %c2_i32 : i32
    %1 = arith.addi %0, %arg1 : i32
    %c0_i32 = arith.constant 0 : i32
    %c0_i32_0 = arith.constant 0 : i32
    return %c0_i32, %1 : i32, i32
  }
  func.func @transform_2(%arg0: i32, %arg1: i32) -> (i32, i32) {
    %c0_i32 = arith.constant 0 : i32
    %c0_i32_0 = arith.constant 0 : i32
    %c0_i32_1 = arith.constant 0 : i32
    return %c0_i32, %c0_i32_0 : i32, i32
  }
  func.func @transform_3(%arg0: i32, %arg1: i32) -> (i32, i32) {
    %c0_i32 = arith.constant 0 : i32
    %c0_i32_0 = arith.constant 0 : i32
    %c0_i32_1 = arith.constant 0 : i32
    return %c0_i32, %c0_i32_0 : i32, i32
  }
  func.func @transform_4(%arg0: i32, %arg1: i32) -> (i32, i32) {
    %c0_i32 = arith.constant 0 : i32
    %c0_i32_0 = arith.constant 0 : i32
    %c0_i32_1 = arith.constant 0 : i32
    return %c0_i32, %c0_i32_0 : i32, i32
  }
  func.func @transform_5(%arg0: i32, %arg1: i32) -> (i32, i32) {
    %c0_i32 = arith.constant 0 : i32
    %c0_i32_0 = arith.constant 0 : i32
    %c0_i32_1 = arith.constant 0 : i32
    return %c0_i32, %c0_i32_0 : i32, i32
  }
  func.func @transform_6(%arg0: i32, %arg1: i32) -> (i32, i32) {
    %c2_i32 = arith.constant 2 : i32
    %0 = arith.muli %arg0, %c2_i32 : i32
    %1 = arith.addi %0, %arg1 : i32
    %c0_i32 = arith.constant 0 : i32
    %c0_i32_0 = arith.constant 0 : i32
    return %c0_i32, %1 : i32, i32
  }
  func.func @transform_7(%arg0: i32, %arg1: i32) -> (i32, i32, i32) {
    %c0_i32 = arith.constant 0 : i32
    %c0_i32_0 = arith.constant 0 : i32
    %c0_i32_1 = arith.constant 0 : i32
    return %arg0, %c0_i32, %c0_i32_0 : i32, i32, i32
  }
}

</mosaic_0001>

<bundles_post_ra>
// kernel: tpu_custom_call.1
= control target key start
LH: loop header
LB: loop body
LE: loop exit
PB: predicated region body
PF: predicated region fallthrough
CT: control target
= control target key end

     0   :  { %s2002_s0 = inlined_call_operand.hbm [shape: bf16[32,512], index: 0, kind: input, shape index: {}]   ;;  %s2003_s1 = inlined_call_operand.hbm [shape: bf16[4,512], index: 1, kind: input, shape index: {}]   ;;  %s2004_s2 = inlined_call_operand.hbm [shape: bf16[8,32], index: 2, kind: input, shape index: {}]   ;;  %s2005_s3 = inlined_call_operand.hbm [shape: f32[8,1], index: 3, kind: input, shape index: {}]   ;;  %s2006_s4 = inlined_call_operand.hbm [shape: f32[8,8], index: 4, kind: input, shape index: {}]   ;;  %s2007_s5 = inlined_call_operand.hbm [shape: f32[8,1], index: 5, kind: input, shape index: {}]   ;;  %s2008_s6 = inlined_call_operand.hbm [shape: bf16[3,512], index: 6, kind: output, shape index: {0}]   ;;  %s2009_s7 = inlined_call_operand.hbm [shape: f32[2,8,1], index: 7, kind: output, shape index: {1}]  }
   0x1   :  { %2029 = sst [smem:[#allocation35_spill]] %s2002_s0 }
   0x2   :  { %2030 = sst [smem:[#allocation36_spill]] %s2004_s2 }
   0x3   :  { %2031 = sst [smem:[#allocation37_spill]] %s2005_s3 }
   0x4   :  { %2032 = sst [smem:[#allocation38_spill]] %s2006_s4 }
   0x5   :  { %2033 = sst [smem:[#allocation39_spill]] %s2007_s5 }
   0x6   :  { %2034 = sst [smem:[#allocation40_spill]] %s2008_s6 }
   0x7   :  { %2035 = sst [smem:[#allocation41_spill]] %s2009_s7 }
   0x8   :  { %13 = vsyncpa [#allocation4], 0 }
   0x9   :  { %15 = vsyncpa [#allocation4 + $0x1], 0 }
   0xa   :  { %16 = vsyncpa [#allocation7], 0 }
   0xb   :  { %18 = vsyncpa [#allocation7 + $0x1], 0 }
   0xc   :  { %19 = vsyncpa [#allocation10], 0 }
   0xd   :  { %20 = vsyncpa [#allocation13], 0 }
   0xe   :  { %21 = vsyncpa [#allocation5], 0 }
   0xf   :  { %23 = vsyncpa [#allocation5 + $0x1], 0 }
  0x10   :  { %24 = vsyncpa [#allocation16], 0 }
  0x11   :  { %26 = vsyncpa [#allocation16 + $0x1], 0  ;;  %s1540_s24 = smov 0   ;;  %s1542_s25 = smov 0  }
  0x12   :  { %s1544_s26 = smov 0   ;;  %s1546_s27 = smov 0  }
  0x13   :  { %s1548_s28 = smov 0   ;;  %s1550_s29 = smov 0  }
  0x14   :  { %s1552_s30 = smov 0   ;;  %s1554_s8 = smov 0  }
  0x15   :  { %s1556_s9 = smov 0   ;;  %s1558_s10 = smov 0  }
  0x16   :  { %s1560_s11 = smov 0  }
  0x17 LB: > { %2036 = sst [smem:[#allocation24_spill]] %s1442_s24  ;;  %s1596_s12 = sadd.s32 4294967295, %s1482_s11   ;;  %s1482_s11 = sphi %s1560_s11, %s32_s11   ;;  %s1478_s10 = sphi %s1558_s10, %s2089_s10   ;;  %s1474_s9 = sphi %s1556_s9, %s2088_s9   ;;  %s1470_s8 = sphi %s1554_s8, %s2096_s8   ;;  %s1466_s30 = sphi %s1552_s30, %s2086_s30   ;;  %s1462_s29 = sphi %s1550_s29, %s2095_s29   ;;  %s1458_s28 = sphi %s1548_s28, %s2094_s28   ;;  %s1454_s27 = sphi %s1546_s27, %s2093_s27   ;;  %s1450_s26 = sphi %s1544_s26, %s2092_s26   ;;  %s1446_s25 = sphi %s1542_s25, %s2091_s25   ;;  %s1442_s24 = sphi %s1540_s24, %s2090_s24  }
  0x18   : > { %2037 = sst [smem:[#allocation25_spill]] %s1454_s27  ;;  %s903_s13 = sadd.s32 4294967294, %s1482_s11  }
  0x19   : > { %2038 = sst [smem:[#allocation26_spill]] %s1470_s8  ;;  %p68_p0 = scmp.ne.s32.totalorder %s1458_s28, %s1454_s27 }
  0x1a   : > { %2039 = sst [smem:[#allocation27_spill]] %s1474_s9  ;;  %p2017_p1 = scmp.eq.s32.totalorder %s1596_s12, 0 }
  0x1b   : > { %2040 = sst [smem:[#allocation28_spill]] %s1478_s10  ;;  %p2018_p2 = scmp.eq.s32.totalorder %s1596_s12, 3 }
  0x1c   : > { %p216_p3 = scmp.eq.s32.totalorder %s903_s13, 3  ;;  %p1605_p4 = por %p2017_p1, %p68_p0 }
  0x1d   : > { %p235_p6 = scmp.ne.s32.totalorder %s1450_s26, %s1446_s25  ;;  %p241_p7 = scmp.ne.s32.totalorder %s1446_s25, %s1442_s24 }
  0x1e   : > { %s2041_s14 = scalar_select %p1605_p4, 1, 0 }
  0x1f   : > { %p1610_p5 = por %p216_p3, %p68_p0  ;;  %p910_p8 = scmp.ge.s32.totalorder %s1482_s11, 1 }
  0x20   : > { %p1621_p9 = por %p235_p6, %p2018_p2  ;;  %p249_p10 = scmp.lt.s32.totalorder %s1482_s11, 5 }
  0x21   : > { %s2042_s16 = scalar_select %p1610_p5, 1, 0 }
  0x22   : > { %s2044_s17 = scalar_select %p1621_p9, 1, 0 }
  0x23   : > { %2043 = sst [smem:[#allocation29_spill]] %s2042_s16  ;;  %p1626_p11 = por %p241_p7, %p216_p3 }
  0x24   : > { %2045 = sst [smem:[#allocation30_spill]] %s2044_s17  ;;  %p1630_p12 = pnand %p910_p8, %p249_p10 }
  0x25   : > { %s2046_s18 = scalar_select %p1626_p11, 1, 0 }
  0x26   : > { %s2048_s19 = scalar_select %p1630_p12, 1, 0 }
  0x27   : > { %2047 = sst [smem:[#allocation31_spill]] %s2046_s18  ;;  %s1484_s20 = smov [#allocation8]  }
  0x28   : > { %s262_s21 = sshll.u32 %s1484_s20, 4  ;;  %p988_p13 = pneg %p1630_p12  ;;  %s263_s21 = int_to_ptr.vmem [resolvable:$true] %s262_s21 }
  0x29   : > { %s1485_s23 = smov [#allocation9]   ;;  %s1486_s15 = smov [#allocation11]  }
  0x2a   : > { %p1638_p0 = pnand %p988_p13, %p2017_p1  ;;  %s273_s13 = sshll.u32 %s1485_s23, 4  ;;  %s1642_s13 = int_to_ptr.vmem [resolvable:$true] %s273_s13 }
  0x2b   : > { %s284_s18 = sshll.u32 %s1486_s15, 4  ;;  %s2050_s2 = sld [smem:[#allocation36_spill]]  ;;  %s1644_s18 = int_to_ptr.vmem [resolvable:$true] %s284_s18 }
  0x2c   : > { %p1654_p6 = pneg %p1638_p0 }
  0x31   : > { %s1140_s20 = scalar_lea.hbm %s2050_s2, 64 }
  0x32   : > { %p1141_p3 = scmp.ne.s32.totalorder %s2050_s2, %s1140_s20  ;;  %p1147_p10 = scmp.lt.u32.totalorder %s1140_s20, %s2050_s2 }
  0x34   : > { %p1143_p7 = pnand %p1654_p6, %p1141_p3 }
  0x36   : > { %p1144_p8 = pneg %p1143_p7 }
  0x38   : > { %p1149_p13 = pnand %p1147_p10, %p1144_p8 }
  0x3a   : > { %1152 = shalt.err (!%p1149_p13)
}
  0x3b   : > { %s1153_s24 = scalar_lea.vmem %s263_s21, 64  ;;  %p1161_p5 = scmp.lt.s32.totalorder %s263_s21, %s263_s21 }
  0x3c   : > { %p1154_p1 = scmp.ne.s32.totalorder %s263_s21, %s1153_s24  ;;  %p1162_p9 = scmp.lt.s32.totalorder %s1153_s24, %s1153_s24 }
  0x3e   : > { %p1156_p2 = pnand %p1154_p1, %p1654_p6  ;;  %p1163_p4 = por %p1162_p9, %p1161_p5 }
  0x40   : > { %p1157_p11 = pneg %p1156_p2 }
  0x42   : > { %p1164_p12 = pnand %p1163_p4, %p1157_p11 }
  0x44   : > { %1167 = shalt.err (!%p1164_p12)
}
  0x45   : > { %991 = dma.hbm_to_vmem [thread:$0]  (!%p1638_p0), %s2050_s2, 64, %s263_s21, [#allocation7]  }
  0x46   : > { %s2052_s3 = sld [smem:[#allocation37_spill]] }
  0x4c   : > { %s1168_s15 = scalar_lea.hbm %s2052_s3, 128 }
  0x4d   : > { %p1169_p1 = scmp.ne.s32.totalorder %s2052_s3, %s1168_s15  ;;  %p1175_p4 = scmp.lt.u32.totalorder %s1168_s15, %s2052_s3 }
  0x4f   : > { %p1171_p2 = pnand %p1169_p1, %p1654_p6 }
  0x51   : > { %p1172_p5 = pneg %p1171_p2 }
  0x53   : > { %p1177_p9 = pnand %p1175_p4, %p1172_p5 }
  0x55   : > { %1180 = shalt.err (!%p1177_p9)
}
  0x56   : > { %s1181_s21 = scalar_lea.vmem %s1642_s13, 128  ;;  %p1189_p7 = scmp.lt.s32.totalorder %s1642_s13, %s1642_s13 }
  0x57   : > { %p1182_p11 = scmp.ne.s32.totalorder %s1642_s13, %s1181_s21  ;;  %p1190_p8 = scmp.lt.s32.totalorder %s1181_s21, %s1181_s21 }
  0x59   : > { %p1184_p12 = pnand %p1182_p11, %p1654_p6  ;;  %p1191_p10 = por %p1190_p8, %p1189_p7 }
  0x5b   : > { %p1185_p3 = pneg %p1184_p12 }
  0x5d   : > { %p1192_p13 = pnand %p1191_p10, %p1185_p3 }
  0x5f   : > { %1195 = shalt.err (!%p1192_p13)
}
  0x60   : > { %994 = dma.hbm_to_vmem [thread:$0]  (!%p1638_p0), %s2052_s3, 128, %s1642_s13, [#allocation10]  }
  0x61   : > { %s2053_s4 = sld [smem:[#allocation38_spill]] }
  0x67   : > { %s1196_s16 = scalar_lea.hbm %s2053_s4, 128 }
  0x68   : > { %p1197_p1 = scmp.ne.s32.totalorder %s2053_s4, %s1196_s16  ;;  %p1203_p4 = scmp.lt.u32.totalorder %s1196_s16, %s2053_s4 }
  0x6a   : > { %p1199_p2 = pnand %p1197_p1, %p1654_p6 }
  0x6c   : > { %p1200_p5 = pneg %p1199_p2 }
  0x6e   : > { %p1205_p9 = pnand %p1203_p4, %p1200_p5 }
  0x70   : > { %1208 = shalt.err (!%p1205_p9)
}
  0x71   : > { %s1209_s13 = scalar_lea.vmem %s1644_s18, 128  ;;  %p1217_p7 = scmp.lt.s32.totalorder %s1644_s18, %s1644_s18 }
  0x72   : > { %p1210_p11 = scmp.ne.s32.totalorder %s1644_s18, %s1209_s13  ;;  %p1218_p8 = scmp.lt.s32.totalorder %s1209_s13, %s1209_s13 }
  0x74   : > { %p1212_p12 = pnand %p1210_p11, %p1654_p6  ;;  %p1219_p10 = por %p1218_p8, %p1217_p7 }
  0x76   : > { %p1213_p3 = pneg %p1212_p12 }
  0x78   : > { %p1220_p13 = pnand %p1219_p10, %p1213_p3 }
  0x7a   : > { %1223 = shalt.err (!%p1220_p13)
}
  0x7b   : > { %997 = dma.hbm_to_vmem [thread:$0]  (!%p1638_p0), %s2053_s4, 128, %s1644_s18, [#allocation10]  }
  0x7c   : > { %s1487_s8 = smov [#allocation12]   ;;  %s2054_s5 = sld [smem:[#allocation39_spill]] }
  0x7d   : > { %s295_s7 = sshll.u32 %s1487_s8, 4  ;;  %s296_s7 = int_to_ptr.vmem [resolvable:$true] %s295_s7 }
  0x82   : > { %s1224_s20 = scalar_lea.hbm %s2054_s5, 128 }
  0x83   : > { %p1225_p1 = scmp.ne.s32.totalorder %s2054_s5, %s1224_s20  ;;  %p1231_p4 = scmp.lt.u32.totalorder %s1224_s20, %s2054_s5 }
  0x85   : > { %p1227_p2 = pnand %p1225_p1, %p1654_p6 }
  0x87   : > { %p1228_p5 = pneg %p1227_p2 }
  0x89   : > { %p1233_p9 = pnand %p1231_p4, %p1228_p5 }
  0x8b   : > { %1236 = shalt.err (!%p1233_p9)
}
  0x8c   : > { %s1237_s18 = scalar_lea.vmem %s296_s7, 128  ;;  %p1245_p7 = scmp.lt.s32.totalorder %s296_s7, %s296_s7 }
  0x8d   : > { %p1238_p11 = scmp.ne.s32.totalorder %s296_s7, %s1237_s18  ;;  %p1246_p8 = scmp.lt.s32.totalorder %s1237_s18, %s1237_s18 }
  0x8f   : > { %p1240_p12 = pnand %p1238_p11, %p1654_p6  ;;  %p1247_p10 = por %p1246_p8, %p1245_p7 }
  0x91   : > { %p1241_p3 = pneg %p1240_p12 }
  0x93   : > { %p1248_p13 = pnand %p1247_p10, %p1241_p3 }
  0x95   : > { %1251 = shalt.err (!%p1248_p13)
}
  0x96   : > { %1000 = dma.hbm_to_vmem [thread:$0]  (!%p1638_p0), %s2054_s5, 128, %s296_s7, [#allocation13]  }
  0x97   : > { %s41_s17 = sadd.s32 1, %s1474_s9  ;;  %s44_s22 = sadd.s32 1, %s1478_s10 }
  0x98   : > { %p42_p6 = scmp.ge.s32.totalorder %s41_s17, 2  ;;  %s904_s8 = sshll.u32 %s1478_s10, 1 }
  0x99   : > { %s55_s27 = sadd.s32 1, %s1462_s29  ;;  %s1742_s16 = sadd.s32 %s1474_s9, %s904_s8 }
  0x9a   : > { %s2098_s17 = smov (%p42_p6, %s41_s17), 0  ;;  %s2100_s22 = smov (!%p42_p6, %s44_s22), %s1478_s10 }
  0x9b   : > { %2055 = sst [smem:[#allocation32_spill]] %s2098_s17  ;;  %p62_p1 = scmp.ne.s32.totalorder %s1462_s29, %s1458_s28 }
  0x9c   : > { %p46_p2 = scmp.ge.s32.totalorder %s2100_s22, 2  ;;  %p63_p0 = scmp.eq.s32.totalorder %s1482_s11, 0 }
  0x9d   : > { %p2056_p5 = scmp.eq.s32.totalorder %s1596_s12, 3  ;;  %p1019_p9 = scmp.lt.s32.totalorder %s1482_s11, 4 }
  0x9e   : > { %s2102_s22 = smov (%p46_p2, %s2100_s22), 0  ;;  %p1756_p11 = por %p63_p0, %p62_p1 }
  0x9f   : > { %p1749_p4 = por %p2056_p5, %p62_p1  ;;  %2058 = sst [smem:[#allocation33_spill]] %s2102_s22 }
  0xa0   : > { %s1761_s15 = sand.u32 1, %s1462_s29   ;;  %s905_s23 = sshll.u32 %s2102_s22, 1 }
  0xa1   : > { %s2057_s7 = scalar_select %p1749_p4, 1, 0 }
  0xa2   : > { %s222_s24 = ssub.s32 %s1478_s10, %s2102_s22  ;;  %s51_s13 = sadd.s32 %s905_s23, %s2098_s17 }
  0xa3   : > { %p223_p12 = scmp.eq.s32.totalorder %s222_s24, 0  ;;  %s52_s18 = ssub.s32 %s1742_s16, %s51_s13 }
  0xa4   : > { %p53_p3 = scmp.eq.s32.totalorder %s52_s18, 0  ;;  %s916_s21 = sshll.u32 %s1761_s15, 4 }
  0xa5   : > { %s2060_s6 = sadd.s32 1, %s1450_s26  ;;  %s918_s3 = sshll.u32 %s1742_s16, 6 }
  0xa6   : > { %s1772_s8 = scalar_select %p223_p12, %s1450_s26, %s2060_s6  }
  0xa7   : > { %s1775_s2 = scalar_select %p53_p3, %s1462_s29, %s55_s27  }
  0xa8   : > { %s2062_s0 = sld [smem:[#allocation35_spill]]  ;;  %s310_s23 = scalar_lea.vmem [#allocation3], %s916_s21 }
  0xa9   : > { %2061 = sst [smem:[#allocation34_spill]] %s1775_s2  ;;  %s318_s24 = sshll.u32 %s310_s23, 4  ;;  %s1783_s24 = int_to_ptr.vmem [resolvable:$true] %s318_s24 }
  0xaa   : > { %p1789_p7 = pnand %p1019_p9, %p1756_p11  ;;  %s307_s27 = scalar_lea.sflag [#allocation4], %s1761_s15 }
  0xac   : > { %p1254_p10 = pneg %p1789_p7 }
  0xae   : > { %s1781_s9 = scalar_lea.hbm %s2062_s0, %s918_s3  ;;  %s1257_s20 = scalar_lea.hbm %s2062_s0, 1024 }
  0xaf   : > { %s1252_s4 = scalar_lea.hbm %s1781_s9, 256  ;;  %p1258_p1 = scmp.lt.u32.totalorder %s1781_s9, %s2062_s0 }
  0xb0   : > { %p1253_p8 = scmp.ne.s32.totalorder %s1781_s9, %s1252_s4  ;;  %p1259_p2 = scmp.lt.u32.totalorder %s1257_s20, %s1252_s4 }
  0xb1   : > { %p1261_p5 = scmp.lt.u32.totalorder %s1252_s4, %s1781_s9 }
  0xb2   : > { %p1255_p13 = pnand %p1254_p10, %p1253_p8  ;;  %p1260_p0 = por %p1259_p2, %p1258_p1 }
  0xb4   : > { %p1256_p6 = pneg %p1255_p13  ;;  %p1262_p9 = por %p1261_p5, %p1260_p0 }
  0xb6   : > { %p1263_p11 = pnand %p1262_p9, %p1256_p6 }
  0xb8   : > { %1266 = shalt.err (!%p1263_p11)
}
  0xb9   : > { %s1267_s6 = scalar_lea.vmem %s1783_s24, 256  ;;  %s1488_s23 = smov [#allocation3]  }
  0xba   : > { %p1268_p12 = scmp.ne.s32.totalorder %s1783_s24, %s1267_s6  ;;  %s1272_s3 = sshll.u32 %s1488_s23, 4  ;;  %s1273_s3 = int_to_ptr.vmem [resolvable:$false] %s1272_s3 }
  0xbb   : > { %s1274_s5 = scalar_lea.vmem %s1273_s3, 512  ;;  %p1275_p13 = scmp.lt.s32.totalorder %s1783_s24, %s1273_s3 }
  0xbc   : > { %p1270_p3 = pnand %p1268_p12, %p1254_p10  ;;  %p1276_p1 = scmp.lt.s32.totalorder %s1274_s5, %s1267_s6 }
  0xbe   : > { %p1271_p8 = pneg %p1270_p3  ;;  %p1277_p2 = por %p1276_p1, %p1275_p13 }
  0xc0   : > { %p1278_p0 = pnand %p1277_p2, %p1271_p8 }
  0xc2   : > { %1281 = shalt.err (!%p1278_p0)
}
  0xc3   : > { %s1489_s4 = smov 256   ;;  %s1490_s20 = smov 64  }
  0xc4   : > { %s1491_s18 = smov 4   ;;  %s328_s21 = sand.u32 1, %s1482_s11  }
  0xc5   : > { %1004 = dma.hbm_to_vmem [thread:$0]  (!%p1789_p7), %s1781_s9, 256, %s1783_s24, %s307_s27, %s1489_s4, %s1490_s20, %s1491_s18  }
  0xc6   : > { %s919_s23 = sshll.u32 %s1761_s15, 1  ;;  %s921_s6 = sshll.u32 %s1742_s16, 5 }
  0xc7   : > { %s332_s3 = scalar_lea.vmem [#allocation6], %s919_s23  ;;  %s1827_s17 = scalar_lea.hbm %s2003_s1, %s921_s6 }
  0xc8   : > { %s341_s5 = sshll.u32 %s332_s3, 4  ;;  %s329_s10 = scalar_lea.sflag [#allocation7], %s328_s21  ;;  %s342_s5 = int_to_ptr.vmem [resolvable:$true] %s341_s5 }
  0xc9   : > { %s1282_s2 = scalar_lea.hbm %s1827_s17, 32  ;;  %s1287_s15 = scalar_lea.hbm %s2003_s1, 128 }
  0xca   : > { %p1283_p6 = scmp.ne.s32.totalorder %s1827_s17, %s1282_s2  ;;  %p1288_p11 = scmp.lt.u32.totalorder %s1827_s17, %s2003_s1 }
  0xcb   : > { %p1289_p12 = scmp.lt.u32.totalorder %s1287_s15, %s1282_s2  ;;  %p1291_p8 = scmp.lt.u32.totalorder %s1282_s2, %s1827_s17 }
  0xcc   : > { %p1285_p5 = pnand %p1283_p6, %p1254_p10 }
  0xcd   : > { %p1290_p3 = por %p1289_p12, %p1288_p11 }
  0xce   : > { %p1286_p9 = pneg %p1285_p5 }
  0xcf   : > { %p1292_p13 = por %p1291_p8, %p1290_p3 }
  0xd1   : > { %p1293_p1 = pnand %p1292_p13, %p1286_p9 }
  0xd3   : > { %1296 = shalt.err (!%p1293_p1)
}
  0xd4   : > { %s1297_s22 = scalar_lea.vmem %s342_s5, 32  ;;  %s1492_s27 = smov [#allocation6]  }
  0xd5   : > { %p1298_p2 = scmp.ne.s32.totalorder %s342_s5, %s1297_s22  ;;  %s1302_s4 = sshll.u32 %s1492_s27, 4  ;;  %s1303_s4 = int_to_ptr.vmem [resolvable:$false] %s1302_s4 }
  0xd6   : > { %s1304_s20 = scalar_lea.vmem %s1303_s4, 64  ;;  %p1305_p5 = scmp.lt.s32.totalorder %s342_s5, %s1303_s4 }
  0xd7   : > { %p1300_p0 = pnand %p1298_p2, %p1254_p10  ;;  %p1306_p4 = scmp.lt.s32.totalorder %s1304_s20, %s1297_s22 }
  0xd9   : > { %p1301_p6 = pneg %p1300_p0  ;;  %p1307_p11 = por %p1306_p4, %p1305_p5 }
  0xdb   : > { %p1308_p12 = pnand %p1307_p11, %p1301_p6 }
  0xdd   : > { %1311 = shalt.err (!%p1308_p12)
}
  0xde   : > { %1007 = dma.hbm_to_vmem [thread:$0]  (!%p1789_p7), %s1827_s17, 32, %s342_s5, %s329_s10  }
  0xdf   : > { %p2064_p9 = scmp.ne.s32.totalorder %s2048_s19, 0 }
  0xe0   : > { %s1851_s2 = sand.u32 (!%p2064_p9), 1, %s1458_s28   ;;  %p2065_p10 = scmp.ne.s32.totalorder (!%p2064_p9), %s2041_s14, 0 }
  0xe1   : > { %350 = sbr.rel (%p2064_p9) target bundleno = 967 (0x3c7), region = 44  ;;  %s923_s18 = sshll.u32 (!%p2064_p9), %s1851_s2, 4 }
  0xe2   : > { %s353_s21 = scalar_lea.sflag (!%p2064_p9), [#allocation4], %s1851_s2  ;;  %s356_s23 = scalar_lea.vmem (!%p2064_p9), [#allocation3], %s923_s18 }
  0xe8   : > { %1413 = dma.done.wait (%p2065_p10), %s353_s21, 256  }
  0xe9   : > { %1415 = vsyncadd (%p2065_p10), %s353_s21, 4294967040  ;;  %s361_s10 = sand.u32 1, %s1596_s12   ;;  %s924_s19 = sshll.u32 %s1851_s2, 1 }
  0xea   : > { %s362_s17 = scalar_lea.sflag [#allocation7], %s361_s10  ;;  %s1861_s13 = scalar_lea.vmem [#allocation6], %s924_s19 }
  0xeb   : > { %1417 = dma.done.wait (%p2065_p10), %s362_s17, 32  }
  0xec   : > { %1419 = vsyncadd (%p2065_p10), %s362_s17, 4294967264  ;;  %p2066_p4 = scmp.eq.s32.totalorder %s1596_s12, 0 }
  0xee   : > { %1421 = dma.done.wait (%p2066_p4), [#allocation7], 64   ;;  %p2067_p7 = pmov %p2066_p4 }
  0xef   : > { %p2068_p3 = pmov %p2066_p4 }
  0xf0   : > { %1423 = vsyncadd (%p2067_p7), [#allocation7], 4294967232 }
  0xf1   : > { %1425 = dma.done.wait (%p2068_p3), [#allocation10], 256   ;;  %p2069_p8 = pmov %p2068_p3 }
  0xf2   : > { %p2070_p13 = pmov %p2068_p3 }
  0xf3   : > { %1427 = vsyncadd (%p2069_p8), [#allocation10], 4294967040 }
  0xf4   : > { %1429 = dma.done.wait (%p2070_p13), [#allocation13], 128   ;;  %p2071_p1 = pmov %p2068_p3 }
  0xf5   : > { %s419_s14 = sand.u32 1, %s1446_s25   ;;  %s1884_s3 = scalar_lea.vmem [#allocation14], %s924_s19 }
  0xf6   : > { %1431 = vsyncadd (%p2071_p1), [#allocation13], 4294967168  ;;  %s1882_s6 = sshll.u32 %s419_s14, 3  ;;  %p931_p2 = scmp.ne.s32.totalorder %s1466_s30, 0 }
  0xf7   : > { %s421_s5 = scalar_lea.vmem [#allocation15], %s1882_s6  ;;  %v1493_v0 = vmov (!%p931_p2), 0.0  }
  0xf8   : > { %432 = sbr.rel (%p931_p2) target bundleno = 255 (0xff), region = 72  ;;  %433 = vst [vmem:[#allocation2] sm:$0xff] (!%p931_p2), %v1493_v0 }
  0xff PF: > { %v1126_v1 = vld [vmem:[%s356_s23] sm:$0xff]   ;;  %v1494_v2 = vmov 0.0   ;;  %v1127_v3 = vld [vmem:[%s356_s23 + $0x8] sm:$0xff]   ;;  %vm1495_vm0 = vmmov 0   ;;  %v1496_v5 = vmov 0   ;;  %vm457_vm1 = vcmask 261120  }
 0x100   : > { %951 = vmatprep.subr.bf16.mxu0 %v1494_v2  ;;  %959 = vmatprep.subr.mxu1 %v1494_v2  ;;  %v439_v4 = vld [vmem:[#allocation9] sm:$0xff]  ;;  %v503_v6 = vld [vmem:[#allocation12] sm:$0xff]  ;;  %v438_v7 = vld [vmem:[#allocation8] sm:$0xf]  ;;  %vm509_vm2 = vcmask 64512   ;;  %v607_v16 = vlaneseq  ;;  %vm613_vm3 = vcmask 1041409  }
 0x101   : > { %952 = vmatpush3.bf16.msra.mxu0 %v1126_v1  ;;  %955 = vmatprep.mubr.msk.bf16.mxu0 %vm1495_vm0, %v1494_v2  ;;  %v502_v15 = vld [vmem:[#allocation11] sm:$0xff]  ;;  %v619_v18 = vld [vmem:[%s1861_s13] sm:$0x3]  ;;  %v642_v24 = vld [vmem:[#allocation2 + $0x1] sm:$0x1]  ;;  %p938_p0 = scmp.ne.s32.totalorder %s1466_s30, 1 }
 0x102   : > { %953 = vmatprep.subr.bf16.mxu0 %v1494_v2  ;;  %1125 = vset.pattern.permute.xlu0 %v1496_v5  ;;  %v608_v17 = vshrl.u32 %v607_v16, 7  ;;  %v1889_v21 = vunpack.c.l.bf16 %v619_v18  ;;  %v664_v25 = vld [vmem:[#allocation2 + $0x3] sm:$0x1]  ;;  %v645_v53 = vld [vmem:[#allocation2 + $0x2] sm:$0x1]  ;;  %vm686_vm6 = vcmask (!%p938_p0), 7168  }
 0x103   : > { %442 = vperm.xlu0 %1125, %v439_v4   ;;  %961 = vmatprep.mubr.msk.f32.mxu1 %vm1495_vm0, %v1494_v2  ;;  %v630_v60 = vld [vmem:[#allocation2] sm:$0x1]  ;;  %v1497_v1 = vmov 1983009808   ;;  %vm614_vm4 = vsmask.f32 1280 }
 0x104   : > { %v636_v19 = vsub.s32 1, %v608_v17  ;;  %v655_v20 = vsub.s32 3, %v608_v17  ;;  %v648_v40 = vsub.s32 2, %v608_v17  ;;  %v605_v2 = vunpack.c.l.s4 %v1497_v1  ;;  %vm615_vm5 = vmand %vm613_vm3, %vm614_vm4 }
 0x105   : > { %954 = vmatpush3.bf16.msra.mxu0 %v1127_v3  ;;  %v674_v5 = vmul.f32 %v1889_v21, %v1889_v21 }
 0x106   : > { %v1892_v22 = vrot.slane %v1889_v21, %v636_v19  ;;  %v656_v23 = vrot.slane %v1889_v21, %v655_v20  ;;  %v649_v41 = vrot.slane %v1889_v21, %v648_v40  ;;  %v606_v3 = vunpack.c.0.s8 %v605_v2 }
 0x107   : > { %506 = vperm.xlu0 %1125, %v503_v6  }
 0x108   : > { %956 = vmatmul.mubr.msk.bf16.vlgmr.msra.gmra.mrb[0].mxu0 %vm457_vm1, %v438_v7  ;;  %v643_v26 = vadd.f32 %v642_v24, %v1892_v22  ;;  %v665_v27 = vadd.f32 %v664_v25, %v656_v23  ;;  %v609_v4 = vsub.s32 %v606_v3, %v608_v17 }
 0x10a   : > { %644 = vst [vmem:[#allocation2 + $0x1] sm:$0x1] %v643_v26  ;;  %666 = vst [vmem:[#allocation2 + $0x3] sm:$0x1] %v665_v27 }
 0x182   : > { %v443_v8 = vpop.permute.xlu0 %442 }
 0x186   : > { %v507_v28 = vpop.permute.xlu0 %506 }
 0x1db   : > { %v495_v9 = vpop.f32.mrb[0].mxu0 }
 0x1dc   : > { %v496_v10 = vadd.f32 %v495_v9, %v443_v8  ;;  %v957_v11 = vpop.f32.mrb[1].mxu0 }
 0x1dd   : > { %v498_v12 = vpop.f32.mrb[2].mxu0 }
 0x1de   : > { %v501_v13 = vmax.f32 %v496_v10, 0.0  ;;  %v958_v14 = vpop.f32.mrb[3].mxu0  ;;  %v667_v10 = vld [vmem:[#allocation2 + $0x4] sm:$0x1] }
 0x1df   : > { %v616_v14 = vld [vmem:[%s1884_s3] sm:$0x2] }
 0x1e0   : > { %960 = vmatpush3.msra.mxu1 %v501_v13 }
 0x1e1   : > { %962 = vmatmul.mubr.msk.f32.vlgmr.msra.gmra.mrb[0].mxu1 %vm509_vm2, %v502_v15  ;;  %v672_v15 = vld [vmem:[#allocation2 + $0x5] sm:$0x1] }
 0x2b4   : > { %v579_v29 = vpop.f32.mrb[0].mxu1 }
 0x2b5   : > { %v580_v30 = vadd.f32 %v579_v29, %v507_v28  ;;  %v963_v31 = vpop.f32.mrb[1].mxu1 }
 0x2b7   : > { %v936_v32 = vmul.f32 -1.442695, %v580_v30  ;;  %v622_v33 = vand.u32 2147483647, %v580_v30  ;;  %v621_v50 = vmax.f32 %v580_v30, 0.0  ;;  %v631_v56 = vmul.f32 %v1889_v21, %v580_v30 }
 0x2b9   : > { %1128 = vpow2.f32 %v936_v32  ;;  %v623_v34 = vsub.f32 0.0, %v622_v33 }
 0x2bb   : > { %v624_v35 = vmul.f32 1.442695, %v623_v34 }
 0x2bd   : > { %1130 = vpow2.f32 %v624_v35 }
 0x2c3   : > { %v1129_v36 = vpop.eup %1128 }
 0x2c4   : > { %v586_v37 = vadd.f32 1.0, %v1129_v36 }
 0x2c6   : > { %1132 = vrcp.f32 %v586_v37 }
 0x2c7   : > { %v1131_v38 = vpop.eup %1130 }
 0x2c8   : > { %v626_v39 = vadd.f32 1.0, %v1131_v38 }
 0x2ca   : > { %1134 = vlog2.f32 %v626_v39 }
 0x2d0   : > { %v1133_v42 = vpop.eup %1132 }
 0x2d1   : > { %v590_v43 = vrot.slane %v1133_v42, 1  ;;  %v600_v44 = vpack.c.bf16 %v1133_v42, %v1133_v42  ;;  %v651_v45 = vsub.f32 %v1133_v42, %v649_v41 }
 0x2d3   : > { %v592_v46 = vsub.f32 %v1133_v42, %v590_v43  ;;  %601 = vst [vmem:[%s1884_s3] sm:$0x1] %v600_v44  ;;  %v652_v47 = vand.u32 2147483647, %v651_v45 }
 0x2d4   : > { %v1135_v48 = vpop.eup %1134 }
 0x2d5   : > { %v937_v49 = vmul.f32 -50.0, %v592_v46  ;;  %v628_v51 = vmul.f32 0.6931472, %v1135_v48  ;;  %v658_v52 = vmul.f32 %v656_v23, %v652_v47 }
 0x2d7   : > { %v595_v54 = vmul.f32 1.442695, %v937_v49  ;;  %v629_v55 = vadd.f32 %v628_v51, %v621_v50  ;;  %v660_v57 = vrot.slane %v658_v52, 1 }
 0x2d9   : > { %1136 = vpow2.f32 %v595_v54  ;;  %v632_v58 = vsub.f32 %v629_v55, %v631_v56  ;;  %v662_v59 = vadd.f32 %v660_v57, %v645_v53 }
 0x2db   : > { %v639_v61 = vmul.f32 %v1892_v22, %v632_v58  ;;  %663 = vst [vmem:[#allocation2 + $0x2] sm:$0x1] %v662_v59 }
 0x2dd   : > { %v640_v62 = vadd.f32 %v639_v61, %v630_v60 }
 0x2df   : > { %641 = vst [vmem:[#allocation2] sm:$0x1] %v640_v62 }
 0x2e3   : > { %v1137_v63 = vpop.eup %1136 }
 0x2e4   : > { %v597_v0 = vadd.f32 1.0, %v1137_v63 }
 0x2e6   : > { %1138 = vrcp.f32 %v597_v0 }
 0x2f0   : > { %v1139_v6 = vpop.eup %1138 }
 0x2f1   : > { %v602_v7 = vpack.c.bf16 %v1139_v6, %v1139_v6  ;;  %v668_v8 = vmul.f32 %v1139_v6, %v1889_v21  ;;  %v673_v9 = vmul.f32 %v1139_v6, %v1139_v6 }
 0x2f3   : > { %v610_v11 = vrot.slane %v602_v7, %v609_v4  ;;  %v669_v12 = vmul.f32 %v668_v8, %v1892_v22  ;;  %v675_v13 = vadd.f32 %v674_v5, %v673_v9  ;;  %682 = sbr.rel (%p938_p0) target bundleno = 912 (0x390), region = 76 }
 0x2f5   : > { %v611_v16 = vrot.slane %v610_v11, 7  ;;  %v670_v17 = vadd.f32 %v669_v12, %v667_v10  ;;  %v676_v18 = vmul.f32 %v675_v13, %v1892_v22 }
 0x2f7   : > { %v617_v19 = vsel %vm615_vm5, %v611_v16, %v616_v14  ;;  %671 = vst [vmem:[#allocation2 + $0x4] sm:$0x1] %v670_v17  ;;  %v677_v20 = vadd.f32 %v676_v18, %v672_v15 }
 0x2f8   : > { %618 = vst [vmem:[%s1884_s3] sm:$0x2] %v617_v19 }
 0x2f9   : > { %678 = vst [vmem:[#allocation2 + $0x5] sm:$0x1] %v677_v20 }
 0x300   : > { %v683_v21 = vld [vmem:[#allocation2] sm:$0xff] }
 0x301   : > { %684 = vadd.xlane.f32.xlu0 %v683_v21 }
 0x38e   : > { %v685_v23 = vpop.xlane.xlu0 %684 }
 0x38f   : > { %687 = vst.msk [vmem:[%s421_s5] sm:$0xff] %vm686_vm6, %v685_v23 }
 0x390 PF: > { %s2072_s12 = sld [smem:[#allocation26_spill]]  ;;  %s709_s15 = sshll.u32 %s1884_s3, 4  ;;  %s1913_s15 = int_to_ptr.vmem [resolvable:$true] %s709_s15 }
 0x391   : > { %s2073_s27 = sld [smem:[#allocation40_spill]]  ;;  %s689_s18 = scalar_lea.sflag [#allocation5], %s1851_s2 }
 0x392   : > { %s1312_s21 = scalar_lea.vmem %s1913_s15, 32  ;;  %p2075_p5 = scmp.ne.s32.totalorder %s2057_s7, 0 }
 0x393   : > { %p1313_p6 = scmp.ne.s32.totalorder %s1913_s15, %s1312_s21  ;;  %s1498_s23 = smov [#allocation14]  }
 0x394   : > { %s1316_s10 = sshll.u32 %s1498_s23, 4  ;;  %s1317_s10 = int_to_ptr.vmem [resolvable:$false] %s1316_s10 }
 0x395   : > { %p1314_p11 = pnand %p1313_p6, %p2075_p5  ;;  %p1319_p9 = scmp.lt.s32.totalorder %s1913_s15, %s1317_s10 }
 0x396   : > { %s941_s9 = sshll.u32 %s2072_s12, 1 }
 0x397   : > { %s702_s16 = sadd.s32 %s1466_s30, %s941_s9  ;;  %s2074_s4 = smov %s2073_s27 }
 0x398   : > { %s942_s24 = sshll.u32 %s702_s16, 5  ;;  %p1315_p12 = pneg %p1314_p11 }
 0x399   : > { %s707_s20 = scalar_lea.hbm %s2073_s27, %s942_s24  ;;  %s1318_s30 = scalar_lea.vmem %s1317_s10, 64 }
 0x39a   : > { %p1320_p10 = scmp.lt.s32.totalorder %s1318_s30, %s1312_s21 }
 0x39c   : > { %p1321_p4 = por %p1320_p10, %p1319_p9 }
 0x39e   : > { %p1322_p7 = pnand %p1321_p4, %p1315_p12 }
 0x3a0   : > { %1325 = shalt.err (!%p1322_p7)
}
 0x3a1   : > { %s1326_s19 = scalar_lea.hbm %s707_s20, 32  ;;  %s1330_s13 = scalar_lea.hbm %s2074_s4, 128 }
 0x3a2   : > { %p1327_p3 = scmp.ne.s32.totalorder %s707_s20, %s1326_s19  ;;  %p1331_p1 = scmp.lt.u32.totalorder %s707_s20, %s2074_s4 }
 0x3a3   : > { %p1332_p2 = scmp.lt.u32.totalorder %s1330_s13, %s1326_s19  ;;  %p1334_p6 = scmp.lt.u32.totalorder %s1326_s19, %s707_s20 }
 0x3a4   : > { %p1328_p8 = pnand %p1327_p3, %p2075_p5 }
 0x3a5   : > { %p1333_p0 = por %p1332_p2, %p1331_p1 }
 0x3a6   : > { %p1329_p13 = pneg %p1328_p8 }
 0x3a7   : > { %p1335_p11 = por %p1334_p6, %p1333_p0 }
 0x3a9   : > { %p1336_p12 = pnand %p1335_p11, %p1329_p13 }
 0x3ab   : > { %1339 = shalt.err (!%p1336_p12)
}
 0x3ac   : > { %s2076_s16 = sld [smem:[#allocation30_spill]]  ;;  %s943_s24 = sshll.u32 %s2072_s12, 7 }
 0x3ad   : > { %984 = dma.vmem_to_hbm [thread:$0]  (%p2075_p5), %s1913_s15, 32, %s707_s20, %s689_s18  }
 0x3ae   : > { %s722_s0 = sshll.u32 %s421_s5, 4  ;;  %s2077_s21 = sld [smem:[#allocation41_spill]]  ;;  %s723_s0 = int_to_ptr.vmem [resolvable:$true] %s722_s0 }
 0x3af   : > { %s694_s10 = scalar_lea.sflag [#allocation16], %s419_s14  ;;  %s1340_s30 = scalar_lea.vmem %s723_s0, 128 }
 0x3b0   : > { %p1341_p9 = scmp.ne.s32.totalorder %s723_s0, %s1340_s30  ;;  %s1499_s7 = smov [#allocation15]  }
 0x3b1   : > { %s1344_s19 = sshll.u32 %s1499_s7, 4  ;;  %s1345_s19 = int_to_ptr.vmem [resolvable:$false] %s1344_s19 }
 0x3b2   : > { %p2078_p10 = scmp.ne.s32.totalorder %s2076_s16, 0  ;;  %s1346_s15 = scalar_lea.vmem %s1345_s19, 256 }
 0x3b3   : > { %p1347_p5 = scmp.lt.s32.totalorder %s723_s0, %s1345_s19  ;;  %p1348_p3 = scmp.lt.s32.totalorder %s1346_s15, %s1340_s30 }
 0x3b4   : > { %s1941_s23 = scalar_lea.hbm %s2077_s21, %s943_s24  ;;  %p1342_p4 = pnand %p1341_p9, %p2078_p10 }
 0x3b5   : > { %p1349_p8 = por %p1348_p3, %p1347_p5 }
 0x3b6   : > { %p1343_p7 = pneg %p1342_p4 }
 0x3b8   : > { %p1350_p13 = pnand %p1349_p8, %p1343_p7 }
 0x3ba   : > { %1353 = shalt.err (!%p1350_p13)
}
 0x3bb   : > { %s1354_s14 = scalar_lea.hbm %s1941_s23, 128  ;;  %s1358_s12 = scalar_lea.hbm %s2077_s21, 256 }
 0x3bc   : > { %p1355_p1 = scmp.ne.s32.totalorder %s1941_s23, %s1354_s14  ;;  %p1359_p6 = scmp.lt.u32.totalorder %s1941_s23, %s2077_s21 }
 0x3bd   : > { %p1360_p11 = scmp.lt.u32.totalorder %s1358_s12, %s1354_s14  ;;  %p1362_p9 = scmp.lt.u32.totalorder %s1354_s14, %s1941_s23 }
 0x3be   : > { %p1356_p2 = pnand %p1355_p1, %p2078_p10 }
 0x3bf   : > { %p1361_p12 = por %p1360_p11, %p1359_p6 }
 0x3c0   : > { %p1357_p0 = pneg %p1356_p2 }
 0x3c1   : > { %p1363_p4 = por %p1362_p9, %p1361_p12 }
 0x3c3   : > { %p1364_p7 = pnand %p1363_p4, %p1357_p0 }
 0x3c5   : > { %1367 = shalt.err (!%p1364_p7)
}
 0x3c6   : > { %985 = dma.vmem_to_hbm [thread:$0]  (%p2078_p10), %s723_s0, 128, %s1941_s23, %s694_s10  }
 0x3c7 PF: > { %s2079_s2 = sld [smem:[#allocation25_spill]]  ;;  %s2080_s17 = sld [smem:[#allocation29_spill]] }
 0x3c8   : > { %p1024_p5 = scmp.ge.s32.totalorder %s1482_s11, 2 }
 0x3cd   : > { %s734_s13 = sand.u32 1, %s2079_s2   ;;  %p2081_p3 = scmp.ne.s32.totalorder %s2080_s17, 0 }
 0x3ce   : > { %s735_s3 = scalar_lea.sflag [#allocation5], %s734_s13 }
 0x3cf   : > { %p1009_p8 = pnand %p1024_p5, %p2081_p3 }
 0x3d1   : > { %1433 = dma.done.wait (!%p1009_p8), %s735_s3, 32  }
 0x3d2   : > { %1435 = vsyncadd (!%p1009_p8), %s735_s3, 4294967264  ;;  %s2082_s9 = sld [smem:[#allocation24_spill]]  ;;  %s2083_s24 = sld [smem:[#allocation31_spill]] }
 0x3d8   : > { %s743_s22 = sand.u32 1, %s2082_s9   ;;  %p2084_p13 = scmp.ne.s32.totalorder %s2083_s24, 0 }
 0x3d9   : > { %s744_s27 = scalar_lea.sflag [#allocation16], %s743_s22 }
 0x3da   : > { %p1012_p1 = pnand %p1024_p5, %p2084_p13 }
 0x3dc   : > { %1437 = dma.done.wait (!%p1012_p1), %s744_s27, 128  }
 0x3dd   : > { %1439 = vsyncadd (!%p1012_p1), %s744_s27, 4294967168  ;;  %s32_s11 = sadd.s32 1, %s1482_s11   ;;  %s2085_s16 = sld [smem:[#allocation34_spill]] }
 0x3de   : > { %p29_p10 = scmp.ge.s32.totalorder %s32_s11, 6   ;;  %s2086_s30 = sld [smem:[#allocation27_spill]] }
 0x3df   : > { %s2087_s0 = sld [smem:[#allocation28_spill]]  ;;  %s2088_s9 = sld [smem:[#allocation32_spill]] }
 0x3e0   : > { %s2089_s10 = sld [smem:[#allocation33_spill]]  ;;  %s2090_s24 = smov %s1446_s25 }
 0x3e1   : > { %s2091_s25 = smov %s1450_s26  ;;  %s2092_s26 = smov %s1772_s8 }
 0x3e2   : > { %s2093_s27 = smov %s1458_s28  ;;  %s2094_s28 = smov %s1462_s29 }
 0x3e3   : > { %s2095_s29 = smov %s2085_s16  ;;  %31 = sbr.rel (!%p29_p10) target bundleno = 23 (0x17), region = 143 }
 0x3e5   : > { %s2096_s8 = smov %s2087_s0 }
 0x3ea   :  { %749 = vsyncpa [#allocation4], 1 }
 0x3eb   :  { %751 = vsyncpa [#allocation4 + $0x1], 1 }
 0x3ec   :  { %752 = vsyncpa [#allocation7], 1 }
 0x3ed   :  { %754 = vsyncpa [#allocation7 + $0x1], 1 }
 0x3ee   :  { %755 = vsyncpa [#allocation10], 1 }
 0x3ef   :  { %756 = vsyncpa [#allocation13], 1 }
 0x3f0   :  { %757 = vsyncpa [#allocation5], 1 }
 0x3f1   :  { %759 = vsyncpa [#allocation5 + $0x1], 1 }
 0x3f2   :  { %760 = vsyncpa [#allocation16], 1 }
 0x3f3   :  { %762 = vsyncpa [#allocation16 + $0x1], 1 }

</bundles_post_ra>
